<compile_context>
chip_gen: v7x
topology: tpu7x:2x2x1
jax: 0.10.0
libtpu: 0.0.40
codegen_flags: <defaults>
</compile_context>

<pallas_src>
import functools

import numpy as np
import jax
import jax.numpy as jnp
from jax.experimental import pallas as pl
from jax.experimental.pallas import tpu as pltpu


# ----------------------------------------------------------------------------
# Pallas kernels
# ----------------------------------------------------------------------------
def _mm_body(a_ref, b_ref, s_ref, t_ref, o_ref, acc_ref, relu):
    @pl.when(pl.program_id(2) == 0)
    def _init():
        acc_ref[...] = jnp.zeros_like(acc_ref)

    acc_ref[...] += jnp.dot(a_ref[...], b_ref[...],
                            preferred_element_type=jnp.float32)

    @pl.when(pl.program_id(2) == pl.num_programs(2) - 1)
    def _fin():
        y = acc_ref[...] * s_ref[...] + t_ref[...]
        if relu:
            y = jnp.maximum(y, 0.0)
        o_ref[...] = y.astype(o_ref.dtype)


def _mm_kernel_relu(a_ref, b_ref, s_ref, t_ref, o_ref, acc_ref):
    _mm_body(a_ref, b_ref, s_ref, t_ref, o_ref, acc_ref, True)


def _mm_kernel_plain(a_ref, b_ref, s_ref, t_ref, o_ref, acc_ref):
    _mm_body(a_ref, b_ref, s_ref, t_ref, o_ref, acc_ref, False)


def _mm_kernel_res_relu(a_ref, b_ref, s_ref, t_ref, r_ref, o_ref, acc_ref):
    """Matmul + BN affine + fused residual add + ReLU epilogue."""
    @pl.when(pl.program_id(2) == 0)
    def _init():
        acc_ref[...] = jnp.zeros_like(acc_ref)

    acc_ref[...] += jnp.dot(a_ref[...], b_ref[...],
                            preferred_element_type=jnp.float32)

    @pl.when(pl.program_id(2) == pl.num_programs(2) - 1)
    def _fin():
        y = acc_ref[...] * s_ref[...] + t_ref[...] + r_ref[...]
        o_ref[...] = jnp.maximum(y, 0.0).astype(o_ref.dtype)


def _gap_kernel(x_ref, o_ref):
    # x_ref: (1, H*W, Cb) -> o_ref: (1, 1, Cb)
    o_ref[...] = jnp.mean(x_ref[...], axis=1, keepdims=True)


# ----------------------------------------------------------------------------
# Tiling helpers
# ----------------------------------------------------------------------------
def _round_up(x, m):
    return (x + m - 1) // m * m


def _choose_tk(Kp):
    """Largest multiple of 128 (capped at 2048) that evenly divides Kp."""
    for tk in range(2048, 127, -128):
        if tk <= Kp and Kp % tk == 0:
            return tk
    return 128


def _choose_tn(Np):
    return 256 if Np >= 512 else 128


# ----------------------------------------------------------------------------
# Pallas wrappers
# ----------------------------------------------------------------------------
_VMEM_LIMIT = 32 * 1024 * 1024  # above v5e's 16 MiB scoped default, < v7x physical


@functools.partial(jax.jit, static_argnames=("relu", "n_out"))
def _matmul_affine(a, b, s, t, r, relu, n_out):
    """out = (a @ b) * s + t (+ r) [, ReLU].

    a: [M, K] activations (any float dtype, cast to bf16 here).
    b: [Kp, Np] pre-padded bf16 weights; s/t: [1, Np] f32 affine.
    r: optional [M, n_out] f32 residual fused into the epilogue.
    Returns [M, n_out] f32.
    """
    M, K = a.shape
    Kp, Np = b.shape
    tm = min(128, _round_up(M, 16))
    tn = _choose_tn(Np)
    tk = _choose_tk(Kp)
    Mp = _round_up(M, tm)

    a_p = jnp.pad(a.astype(jnp.bfloat16), ((0, Mp - M), (0, Kp - K)))

    in_specs = [
        pl.BlockSpec((tm, tk), lambda i, j, k: (i, k)),
        pl.BlockSpec((tk, tn), lambda i, j, k: (k, j)),
        pl.BlockSpec((1, tn), lambda i, j, k: (0, j)),
        pl.BlockSpec((1, tn), lambda i, j, k: (0, j)),
    ]
    args = [a_p, b, s, t]

    if r is not None:
        r_p = jnp.pad(r.astype(jnp.float32),
                      ((0, Mp - M), (0, Np - r.shape[1])))
        in_specs.append(pl.BlockSpec((tm, tn), lambda i, j, k: (i, j)))
        args.append(r_p)
        kernel = _mm_kernel_res_relu
    else:
        kernel = _mm_kernel_relu if relu else _mm_kernel_plain

    out = pl.pallas_call(
        kernel,
        out_shape=jax.ShapeDtypeStruct((Mp, Np), jnp.float32),
        grid_spec=pltpu.PrefetchScalarGridSpec(
            num_scalar_prefetch=0,
            grid=(Mp // tm, Np // tn, Kp // tk),
            in_specs=in_specs,
            out_specs=pl.BlockSpec((tm, tn), lambda i, j, k: (i, j)),
            scratch_shapes=[pltpu.VMEM((tm, tn), jnp.float32)],
        ),
        compiler_params=pltpu.CompilerParams(
            dimension_semantics=("parallel", "parallel", "arbitrary"),
            vmem_limit_bytes=_VMEM_LIMIT),
    )(*args)
    return out[:M, :n_out]


@jax.jit
def _global_avg_pool(x):
    # x: [N, H, W, C] -> [N, 1, 1, C], tiled over (batch, channel-block).
    n, h, w, c = x.shape
    cb = 128 if c % 128 == 0 else c
    xr = x.reshape(n, h * w, c)
    out = pl.pallas_call(
        _gap_kernel,
        out_shape=jax.ShapeDtypeStruct((n, 1, c), x.dtype),
        grid=(n, c // cb),
        in_specs=[pl.BlockSpec((1, h * w, cb), lambda i, j: (i, 0, j))],
        out_specs=pl.BlockSpec((1, 1, cb), lambda i, j: (i, 0, j)),
        compiler_params=pltpu.CompilerParams(
            dimension_semantics=("parallel", "parallel"),
            vmem_limit_bytes=_VMEM_LIMIT),
    )(xr)
    return out.reshape(n, 1, 1, c)


# ----------------------------------------------------------------------------
# Plain-JAX glue (layout plumbing, no heavy compute)
# ----------------------------------------------------------------------------
def _extract_patches(x, kh, kw, stride, padding, dilation):
    """x: [N,H,W,C] -> patches [N,OH,OW, kh*kw*C] (kh,kw,C ordering)."""
    # TODO(synk): the kh*kw tap gather is still materialized in HBM by XLA
    # (kh*kw x activation duplication); folding the tap loop into the matmul
    # grid via a shifted-window index_map is a further optimization.
    n, h, w, c = x.shape
    xp = jnp.pad(x, ((0, 0), (padding, padding), (padding, padding), (0, 0)))
    hp, wp = h + 2 * padding, w + 2 * padding
    oh = (hp - dilation * (kh - 1) - 1) // stride + 1
    ow = (wp - dilation * (kw - 1) - 1) // stride + 1
    if kh == 1 and kw == 1 and padding == 0 and stride == 1:
        return x, h, w
    cols = []
    for i in range(kh):
        for j in range(kw):
            cols.append(xp[:, i * dilation: i * dilation + (oh - 1) * stride + 1: stride,
                           j * dilation: j * dilation + (ow - 1) * stride + 1: stride, :])
    return jnp.concatenate(cols, axis=-1), oh, ow


def _conv_bn_act(x, p, stride=1, padding=0, dilation=1, relu=True, residual=None):
    """Conv2d (bias-free) + folded eval-mode BN affine (+ fused residual / ReLU)."""
    kh, kw, cin, cout = p["kh"], p["kw"], p["cin"], p["cout"]
    xb = x.astype(jnp.bfloat16)
    patches, oh, ow = _extract_patches(xb, kh, kw, stride, padding, dilation)
    m = x.shape[0] * oh * ow
    a = patches.reshape(m, kh * kw * cin)
    r = residual.reshape(m, cout) if residual is not None else None
    y = _matmul_affine(a, p["b"], p["s"], p["t"], r, relu, cout)
    return y.reshape(x.shape[0], oh, ow, cout)


def _maxpool_3x3_s2_p1(x):
    n, h, w, c = x.shape
    xp = jnp.pad(x, ((0, 0), (1, 1), (1, 1), (0, 0)),
                 constant_values=-jnp.inf)
    oh = (h + 2 - 3) // 2 + 1
    ow = (w + 2 - 3) // 2 + 1
    out = None
    for i in range(3):
        for j in range(3):
            sl = xp[:, i: i + 2 * (oh - 1) + 1: 2, j: j + 2 * (ow - 1) + 1: 2, :]
            out = sl if out is None else jnp.maximum(out, sl)
    return out


def _bilinear_resize(x, oh, ow):
    """F.interpolate(..., mode='bilinear', align_corners=False) semantics."""
    n, h, w, c = x.shape
    if h == oh and w == ow:
        return x

    def src(o_sz, i_sz):
        s = (jnp.arange(o_sz, dtype=jnp.float32) + 0.5) * (i_sz / o_sz) - 0.5
        s = jnp.maximum(s, 0.0)
        i0 = jnp.minimum(jnp.floor(s).astype(jnp.int32), i_sz - 1)
        i1 = jnp.minimum(i0 + 1, i_sz - 1)
        return i0, i1, s - i0.astype(jnp.float32)

    y0, y1, fy = src(oh, h)
    x0, x1, fx = src(ow, w)
    fy_ = fy[None, :, None, None]
    fx_ = fx[None, None, :, None]
    r0 = x[:, y0, :, :]
    r1 = x[:, y1, :, :]
    top = r0[:, :, x0, :] * (1.0 - fx_) + r0[:, :, x1, :] * fx_
    bot = r1[:, :, x0, :] * (1.0 - fx_) + r1[:, :, x1, :] * fx_
    return top * (1.0 - fy_) + bot * fy_


# ----------------------------------------------------------------------------
# Deterministic parameter construction (weights pre-packed for the kernel)
# ----------------------------------------------------------------------------
class KeyGen:
    def __init__(self, seed):
        self._key = jax.random.PRNGKey(seed)

    def __call__(self):
        self._key, k = jax.random.split(self._key)
        return k


def _prep_conv(w, s, t):
    """Pre-reshape / pre-pad / pre-cast a conv weight + affine to tiled layout."""
    kh, kw, cin, cout = w.shape
    K, N = kh * kw * cin, cout
    Kp = _round_up(K, 128)
    tn = _choose_tn(_round_up(N, 128))
    Np = _round_up(N, tn)
    b = jnp.pad(w.reshape(K, N), ((0, Kp - K), (0, Np - N))).astype(jnp.bfloat16)
    s_p = jnp.pad(s.reshape(1, N).astype(jnp.float32), ((0, 0), (0, Np - N)))
    t_p = jnp.pad(t.reshape(1, N).astype(jnp.float32), ((0, 0), (0, Np - N)))
    return {"b": b, "s": s_p, "t": t_p, "kh": kh, "kw": kw, "cin": cin, "cout": cout}


def _conv_bn(kg, kh, kw, cin, cout):
    """Bias-free conv weight + eval-mode BN folded to (scale, shift)."""
    fan_in = kh * kw * cin
    w = jax.random.normal(kg(), (kh, kw, cin, cout), jnp.float32) * (0.5 / np.sqrt(fan_in))
    gamma = 1.0 + 0.05 * jax.random.normal(kg(), (cout,), jnp.float32)
    beta = 0.05 * jax.random.normal(kg(), (cout,), jnp.float32)
    mean = 0.05 * jax.random.normal(kg(), (cout,), jnp.float32)
    var = jnp.ones((cout,), jnp.float32)
    s = gamma / jnp.sqrt(var + 1e-5)
    t = beta - mean * s
    return _prep_conv(w, s, t)


def _conv_bias(kg, kh, kw, cin, cout):
    """Conv with bias and no BN (bias folded into the affine shift)."""
    fan_in = kh * kw * cin
    w = jax.random.normal(kg(), (kh, kw, cin, cout), jnp.float32) * (0.5 / np.sqrt(fan_in))
    bias = 0.05 * jax.random.normal(kg(), (cout,), jnp.float32)
    return _prep_conv(w, jnp.ones((cout,), jnp.float32), bias)


def _make_block(kg, inp, planes, stride, dilation, downsample,
                conv1_k=1, conv1_pad=0, ds_inp=None):
    return {
        "conv1": _conv_bn(kg, conv1_k, conv1_k, inp, planes),
        "conv1_pad": conv1_pad,
        "conv2": _conv_bn(kg, 3, 3, planes, planes),
        "conv3": _conv_bn(kg, 1, 1, planes, planes * 4),
        "stride": stride,
        "dilation": dilation,
        "ds": _conv_bn(kg, 1, 1, ds_inp if ds_inp is not None else inp, planes * 4)
              if downsample else None,
    }


def build_params(seed=42):
    kg = KeyGen(seed)
    p = {}
    # custom stem: Conv2d(1,16,3,stride=1,pad=1,bias=False) + BN(16)
    p["stem"] = _conv_bn(kg, 3, 3, 1, 16)

    # layer1 (planes=64, 3 blocks).
    # TODO(synk): the module's layer1[0].conv1 = Conv2d(16,64,3x3) has padding=0 and
    # its downsample still expects 64 input channels -> shape-inconsistent in PyTorch;
    # here we use padding=1 and a 16->256 downsample so the residual add is valid.
    layer1 = [_make_block(kg, 16, 64, 1, 1, True, conv1_k=3, conv1_pad=1, ds_inp=16)]
    layer1 += [_make_block(kg, 256, 64, 1, 1, False) for _ in range(2)]
    p["layer1"] = layer1

    # layer2 (planes=128, 4 blocks, stride 2)
    layer2 = [_make_block(kg, 256, 128, 2, 1, True)]
    layer2 += [_make_block(kg, 512, 128, 1, 1, False) for _ in range(3)]
    p["layer2"] = layer2

    # layer3 (planes=256, 6 blocks, stride replaced with dilation=2)
    layer3 = [_make_block(kg, 512, 256, 1, 1, True)]
    layer3 += [_make_block(kg, 1024, 256, 1, 2, False) for _ in range(5)]
    p["layer3"] = layer3

    # layer4 (planes=512, 3 blocks, stride replaced with dilation=4)
    layer4 = [_make_block(kg, 1024, 512, 1, 2, True)]
    layer4 += [_make_block(kg, 2048, 512, 1, 4, False) for _ in range(2)]
    p["layer4"] = layer4

    # DeepLabHead: ASPP(2048, [12,24,36]) -> 3x3 conv -> 1x1 conv to 21 classes
    p["aspp"] = {
        "b0": _conv_bn(kg, 1, 1, 2048, 256),
        "b1": _conv_bn(kg, 3, 3, 2048, 256),
        "b2": _conv_bn(kg, 3, 3, 2048, 256),
        "b3": _conv_bn(kg, 3, 3, 2048, 256),
        "pool": _conv_bn(kg, 1, 1, 2048, 256),
        "project": _conv_bn(kg, 1, 1, 5 * 256, 256),
    }
    p["head"] = {
        "conv": _conv_bn(kg, 3, 3, 256, 256),
        "final": _conv_bias(kg, 1, 1, 256, 21),
    }
    return p


# ----------------------------------------------------------------------------
# Forward pass
# ----------------------------------------------------------------------------
def _bottleneck(x, blk):
    if blk["ds"] is not None:
        identity = _conv_bn_act(x, blk["ds"], stride=blk["stride"], relu=False)
    else:
        identity = x
    out = _conv_bn_act(x, blk["conv1"], stride=1, padding=blk["conv1_pad"],
                       dilation=1, relu=True)
    out = _conv_bn_act(out, blk["conv2"], stride=blk["stride"],
                       padding=blk["dilation"], dilation=blk["dilation"], relu=True)
    # residual add + ReLU fused into the conv3 matmul epilogue
    out = _conv_bn_act(out, blk["conv3"], relu=True, residual=identity)
    return out


def deeplabv3_forward(params, x_nchw):
    # layout: input/output NCHW, internal NHWC.
    x = jnp.transpose(x_nchw, (0, 2, 3, 1)).astype(jnp.float32)
    hin, win = x.shape[1], x.shape[2]

    h = _conv_bn_act(x, params["stem"], stride=1, padding=1, relu=True)
    h = _maxpool_3x3_s2_p1(h)
    for name in ("layer1", "layer2", "layer3", "layer4"):
        for blk in params[name]:
            h = _bottleneck(h, blk)
    feat = h  # 2048-channel backbone output
    fh, fw = feat.shape[1], feat.shape[2]

    aspp = params["aspp"]
    branches = [
        _conv_bn_act(feat, aspp["b0"], relu=True),
        _conv_bn_act(feat, aspp["b1"], padding=12, dilation=12, relu=True),
        _conv_bn_act(feat, aspp["b2"], padding=24, dilation=24, relu=True),
        _conv_bn_act(feat, aspp["b3"], padding=36, dilation=36, relu=True),
    ]
    pooled = _global_avg_pool(feat)
    pooled = _conv_bn_act(pooled, aspp["pool"], relu=True)
    branches.append(_bilinear_resize(pooled, fh, fw))
    cat = jnp.concatenate(branches, axis=-1)  # 1280 channels
    proj = _conv_bn_act(cat, aspp["project"], relu=True)
    # TODO(synk): nn.Dropout(0.5) in the ASPP projection is a no-op in eval mode;
    # training-mode dropout is not implemented.

    head = params["head"]
    hh = _conv_bn_act(proj, head["conv"], padding=1, relu=True)
    logits = _conv_bn_act(hh, head["final"], relu=False)
    out = _bilinear_resize(logits, hin, win)
    out = jnp.transpose(out, (0, 3, 1, 2))  # back to NCHW, 21 classes

    # TODO(synk): the module's aux_classifier (shared ASPP -> Linear(1280,100) ->
    # Linear(100,2)) is shape-inconsistent with the layer3 feature and cannot
    # execute; the 'aux' output is omitted.
    return {"out": out}


# ----------------------------------------------------------------------------
if __name__ == "__main__":
    params = build_params(seed=42)
    x = jax.random.normal(jax.random.PRNGKey(0), (2, 1, 16, 16), jnp.float32)

    out = deeplabv3_forward(params, x)
    jax.block_until_ready(out)

    assert out["out"].shape == (2, 21, 16, 16), out["out"].shape
    assert bool(jnp.all(jnp.isfinite(out["out"])))
    print("KERNEL_OK")
</pallas_src>

<mosaic_0001>
module attributes {stable_mosaic.version = 11 : i64} {
  func.func @_mm_kernel_relu(%arg0: i32, %arg1: i32, %arg2: i32, %arg3: memref<128x128xbf16, #tpu.memory_space<vmem>>, %arg4: memref<128x128xbf16, #tpu.memory_space<vmem>>, %arg5: memref<1x128xf32, #tpu.memory_space<vmem>>, %arg6: memref<1x128xf32, #tpu.memory_space<vmem>>, %arg7: memref<128x128xf32, #tpu.memory_space<vmem>>, %arg8: memref<128x128xf32, #tpu.memory_space<vmem>>) attributes {dimension_semantics = [#tpu.dimension_semantics<parallel>, #tpu.dimension_semantics<parallel>, #tpu.dimension_semantics<arbitrary>], iteration_bounds = array<i64: 4, 1, 1>, scalar_prefetch = 0 : i64, scratch_operands = 1 : i64, tpu.core_type = #tpu.core_type<tc>, window_params = [{transform_indices = @transform_0, window_bounds = array<i64: 128, 128>}, {transform_indices = @transform_1, window_bounds = array<i64: 128, 128>}, {transform_indices = @transform_2, window_bounds = array<i64: 1, 128>}, {transform_indices = @transform_3, window_bounds = array<i64: 1, 128>}, {transform_indices = @transform_4, window_bounds = array<i64: 128, 128>}]} {
    %c0_i32 = arith.constant 0 : i32
    %0 = arith.cmpi eq, %arg2, %c0_i32 : i32
    %1 = arith.extui %0 : i1 to i32
    %c0_i32_0 = arith.constant 0 : i32
    %2 = arith.cmpi ne, %1, %c0_i32_0 : i32
    scf.if %2 {
      %cst_10 = arith.constant 0.000000e+00 : f32
      %12 = vector.broadcast %cst_10 : f32 to vector<128x128xf32>
      %c0_11 = arith.constant 0 : index
      %c0_12 = arith.constant 0 : index
      %13 = vector.load %arg8[%c0_11, %c0_12] : memref<128x128xf32, #tpu.memory_space<vmem>>, vector<128x128xf32>
      tpu.vector_store %arg8[%c0_11, %c0_12], %12 {strides = array<i32>} : memref<128x128xf32, #tpu.memory_space<vmem>>, vector<128x128xf32>,
    } else {
    }
    %c0 = arith.constant 0 : index
    %c0_1 = arith.constant 0 : index
    %3 = vector.load %arg8[%c0, %c0_1] : memref<128x128xf32, #tpu.memory_space<vmem>>, vector<128x128xf32>
    %c0_2 = arith.constant 0 : index
    %c0_3 = arith.constant 0 : index
    %4 = vector.load %arg3[%c0_2, %c0_3] : memref<128x128xbf16, #tpu.memory_space<vmem>>, vector<128x128xbf16>
    %c0_4 = arith.constant 0 : index
    %c0_5 = arith.constant 0 : index
    %5 = vector.load %arg4[%c0_4, %c0_5] : memref<128x128xbf16, #tpu.memory_space<vmem>>, vector<128x128xbf16>
    %cst = arith.constant dense<0.000000e+00> : vector<128x128xf32>
    %6 = tpu.matmul %4, %5, %cst {dimension_numbers = #tpu.dot_dimension_numbers<[1], [0], [0], [1], [0, 0, 1, 1], [], []>} : vector<128x128xbf16>, vector<128x128xbf16>, vector<128x128xf32> -> vector<128x128xf32>
    %7 = arith.addf %3, %6 : vector<128x128xf32>
    %c0_6 = arith.constant 0 : index
    %c0_7 = arith.constant 0 : index
    %8 = vector.load %arg8[%c0_6, %c0_7] : memref<128x128xf32, #tpu.memory_space<vmem>>, vector<128x128xf32>
    tpu.vector_store %arg8[%c0_6, %c0_7], %7 {strides = array<i32>} : memref<128x128xf32, #tpu.memory_space<vmem>>, vector<128x128xf32>,
    %c0_i32_8 = arith.constant 0 : i32
    %9 = arith.cmpi eq, %arg2, %c0_i32_8 : i32
    %10 = arith.extui %9 : i1 to i32
    %c0_i32_9 = arith.constant 0 : i32
    %11 = arith.cmpi ne, %10, %c0_i32_9 : i32
    scf.if %11 {
      %c0_10 = arith.constant 0 : index
      %c0_11 = arith.constant 0 : index
      %12 = vector.load %arg8[%c0_10, %c0_11] : memref<128x128xf32, #tpu.memory_space<vmem>>, vector<128x128xf32>
      %c0_12 = arith.constant 0 : index
      %c0_13 = arith.constant 0 : index
      %13 = vector.load %arg5[%c0_12, %c0_13] : memref<1x128xf32, #tpu.memory_space<vmem>>, vector<1x128xf32>
      %14 = vector.broadcast %13 : vector<1x128xf32> to vector<128x128xf32>
      %15 = arith.mulf %12, %14 : vector<128x128xf32>
      %c0_14 = arith.constant 0 : index
      %c0_15 = arith.constant 0 : index
      %16 = vector.load %arg6[%c0_14, %c0_15] : memref<1x128xf32, #tpu.memory_space<vmem>>, vector<1x128xf32>
      %17 = vector.broadcast %16 : vector<1x128xf32> to vector<128x128xf32>
      %18 = arith.addf %15, %17 : vector<128x128xf32>
      %cst_16 = arith.constant 0.000000e+00 : f32
      %19 = vector.broadcast %cst_16 : f32 to vector<128x128xf32>
      %20 = arith.maximumf %18, %19 : vector<128x128xf32>
      %c0_17 = arith.constant 0 : index
      %c0_18 = arith.constant 0 : index
      %21 = vector.load %arg7[%c0_17, %c0_18] : memref<128x128xf32, #tpu.memory_space<vmem>>, vector<128x128xf32>
      tpu.vector_store %arg7[%c0_17, %c0_18], %20 {strides = array<i32>} : memref<128x128xf32, #tpu.memory_space<vmem>>, vector<128x128xf32>,
    } else {
    }
    return
  }
  func.func @transform_0(%arg0: i32, %arg1: i32, %arg2: i32) -> (i32, i32) {
    %c0_i32 = arith.constant 0 : i32
    return %arg0, %arg2 : i32, i32
  }
  func.func @transform_1(%arg0: i32, %arg1: i32, %arg2: i32) -> (i32, i32) {
    %c0_i32 = arith.constant 0 : i32
    return %arg2, %arg1 : i32, i32
  }
  func.func @transform_2(%arg0: i32, %arg1: i32, %arg2: i32) -> (i32, i32) {
    %c0_i32 = arith.constant 0 : i32
    %c0_i32_0 = arith.constant 0 : i32
    return %c0_i32, %arg1 : i32, i32
  }
  func.func @transform_3(%arg0: i32, %arg1: i32, %arg2: i32) -> (i32, i32) {
    %c0_i32 = arith.constant 0 : i32
    %c0_i32_0 = arith.constant 0 : i32
    return %c0_i32, %arg1 : i32, i32
  }
  func.func @transform_4(%arg0: i32, %arg1: i32, %arg2: i32) -> (i32, i32) {
    %c0_i32 = arith.constant 0 : i32
    return %arg0, %arg1 : i32, i32
  }
}

</mosaic_0001>

<bundles_post_ra>
// kernel: _matmul_affine.1
= control target key start
LH: loop header
LB: loop body
LE: loop exit
PB: predicated region body
PF: predicated region fallthrough
CT: control target
= control target key end

     0   :  { %s999_s15 = smov 0   ;;  %s1001_s16 = smov 0   ;;  %s1130_s0 = inlined_call_operand.vmem [shape: bf16[512,128], index: 0, kind: input, shape index: {}]   ;;  %s1131_s1 = inlined_call_operand.vmem [shape: bf16[128,128], index: 1, kind: input, shape index: {}]   ;;  %s1132_s2 = inlined_call_operand.vmem [shape: f32[1,128], index: 2, kind: input, shape index: {}]   ;;  %s1133_s3 = inlined_call_operand.vmem [shape: f32[1,128], index: 3, kind: input, shape index: {}]   ;;  %s1134_s4 = inlined_call_operand.vmem [shape: f32[512,128], index: 4, kind: output, shape index: {}]  }
   0x1   :  { %s1003_s17 = smov 0  }
   0x2 LB: > { %s33_s18 = sadd.s32 1, %s968_s16  ;;  %p821_p0 = scmp.ge.s32.totalorder %s972_s17, 1  ;;  %s972_s17 = sphi %s1003_s17, %s14_s17   ;;  %s968_s16 = sphi %s1001_s16, %s1136_s16   ;;  %s964_s15 = sphi %s999_s15, %s1135_s15  }
   0x3   : > { %p35_p1 = scmp.ge.s32.totalorder %s33_s18, 4  ;;  %p221_p2 = scmp.lt.s32.totalorder %s972_s17, 5 }
   0x5   : > { %s1138_s18 = smov (%p35_p1, %s33_s18), 0  ;;  %p222_p3 = pnand %p821_p0, %p221_p2 }
   0x6   : > { %v934_v0 = vld [vmem:[%s1131_s1] sm:$0xff] (!%p222_p3)   ;;  %s822_s21 = sshll.u32 (!%p222_p3), %s964_s15, 4  ;;  %v935_v1 = vld [vmem:[%s1131_s1 + $0x8] sm:$0xff] (!%p222_p3)   ;;  %v936_v2 = vld [vmem:[%s1131_s1 + $0x10] sm:$0xff] (!%p222_p3)  }
   0x7   : > { %225 = sbr.rel (%p222_p3) target bundleno = 269 (0x10d), region = 36  ;;  %p268_p4 = scmp.lt.s32.totalorder (!%p222_p3), %s822_s21, 63  ;;  %862 = vmatprep.subr.bf16.mxu0 (!%p222_p3), %v934_v0  ;;  %894 = vmatprep.subr.bf16.mxu1 (!%p222_p3), %v934_v0  ;;  %v937_v3 = vld [vmem:[%s1131_s1 + $0x18] sm:$0xff] (!%p222_p3)   ;;  %v938_v6 = vld [vmem:[%s1131_s1 + $0x20] sm:$0xff] (!%p222_p3)   ;;  %v939_v7 = vld [vmem:[%s1131_s1 + $0x28] sm:$0xff] (!%p222_p3)  }
   0x8   : > { %863 = vmatpush3.bf16.msra.mxu0 (!%p222_p3), %v934_v0  ;;  %902 = vmatpush3.bf16.msra.mxu1 (!%p222_p3), %v934_v0  ;;  %v940_v8 = vld [vmem:[%s1131_s1 + $0x30] sm:$0xff] (!%p222_p3)   ;;  %v941_v9 = vld [vmem:[%s1131_s1 + $0x38] sm:$0xff] (!%p222_p3)   ;;  %v1060_v16 = vld [vmem:[%s1132_s2] ss:$0 sm:$0xff] (!%p222_p3) }
   0x9   : > { %864 = vmatprep.subr.bf16.mxu0 (!%p222_p3), %v935_v1  ;;  %895 = vmatprep.subr.bf16.mxu1 (!%p222_p3), %v935_v1  ;;  %v1065_v18 = vld [vmem:[%s1133_s3] ss:$0 sm:$0xff] (!%p222_p3) }
   0xc   : > { %865 = vmatpush3.bf16.msra.mxu0 (!%p222_p3), %v935_v1  ;;  %903 = vmatpush3.bf16.msra.mxu1 (!%p222_p3), %v935_v1 }
   0xd   : > { %866 = vmatprep.subr.bf16.mxu0 (!%p222_p3), %v936_v2  ;;  %896 = vmatprep.subr.bf16.mxu1 (!%p222_p3), %v936_v2 }
   0xe   : > { %s1140_s21 = smov (!%p268_p4, %s822_s21), 63 }
   0xf   : > { %s823_s26 = sshll.u32 %s1140_s21, 2  ;;  %s825_s22 = sshll.u32 %s1140_s21, 3 }
  0x10   : > { %s1032_s29 = scalar_lea.vmem %s1130_s0, %s823_s26  ;;  %867 = vmatpush3.bf16.msra.mxu0 %v936_v2  ;;  %904 = vmatpush3.bf16.msra.mxu1 %v936_v2  ;;  %s1079_s24 = scalar_lea.vmem %s1134_s4, %s825_s22 }
  0x11   : > { %v942_v4 = vld [vmem:[%s1032_s29] sm:$0xff]   ;;  %868 = vmatprep.subr.bf16.mxu0 %v937_v3  ;;  %897 = vmatprep.subr.bf16.mxu1 %v937_v3  ;;  %v944_v10 = vld [vmem:[%s1032_s29 + $0x8] sm:$0xff]   ;;  %v946_v12 = vld [vmem:[%s1032_s29 + $0x10] sm:$0xff]  }
  0x12   : > { %v943_v5 = vld [vmem:[%s1032_s29 + $0x20] sm:$0xff]   ;;  %878 = vmatprep.mubr.bf16.mxu0 %v942_v4  ;;  %v945_v11 = vld [vmem:[%s1032_s29 + $0x28] sm:$0xff]   ;;  %v947_v13 = vld [vmem:[%s1032_s29 + $0x30] sm:$0xff]  }
  0x13   : > { %886 = vmatprep.mubr.bf16.mxu1 %v943_v5  ;;  %v948_v14 = vld [vmem:[%s1032_s29 + $0x18] sm:$0xff]  }
  0x14   : > { %869 = vmatpush3.bf16.msra.mxu0 %v937_v3  ;;  %905 = vmatpush3.bf16.msra.mxu1 %v937_v3  ;;  %v949_v15 = vld [vmem:[%s1032_s29 + $0x38] sm:$0xff]  }
  0x15   : > { %870 = vmatprep.subr.bf16.mxu0 %v938_v6  ;;  %898 = vmatprep.subr.bf16.mxu1 %v938_v6 }
  0x18   : > { %871 = vmatpush3.bf16.msra.mxu0 %v938_v6  ;;  %906 = vmatpush3.bf16.msra.mxu1 %v938_v6 }
  0x19   : > { %872 = vmatprep.subr.bf16.mxu0 %v939_v7  ;;  %899 = vmatprep.subr.bf16.mxu1 %v939_v7 }
  0x1c   : > { %873 = vmatpush3.bf16.msra.mxu0 %v939_v7  ;;  %907 = vmatpush3.bf16.msra.mxu1 %v939_v7 }
  0x1d   : > { %874 = vmatprep.subr.bf16.mxu0 %v940_v8  ;;  %900 = vmatprep.subr.bf16.mxu1 %v940_v8 }
  0x20   : > { %875 = vmatpush3.bf16.msra.mxu0 %v940_v8  ;;  %908 = vmatpush3.bf16.msra.mxu1 %v940_v8 }
  0x21   : > { %876 = vmatprep.subr.bf16.mxu0 %v941_v9  ;;  %901 = vmatprep.subr.bf16.mxu1 %v941_v9 }
  0x24   : > { %877 = vmatpush3.bf16.msra.mxu0 %v941_v9  ;;  %909 = vmatpush3.bf16.msra.mxu1 %v941_v9 }
  0x27   : > { %879 = vmatmul.mubr.bf16.vlgmr.msra.gmra.mrb[0].mxu0 %v944_v10  ;;  %887 = vmatmul.mubr.bf16.vlgmr.msra.gmra.mrb[0].mxu1 %v945_v11 }
  0x28   : > { %882 = vmatprep.mubr.bf16.mxu0 %v946_v12  ;;  %890 = vmatprep.mubr.bf16.mxu1 %v947_v13 }
  0x2f   : > { %883 = vmatmul.mubr.bf16.gmra.mrb[4].mxu0 %v948_v14  ;;  %891 = vmatmul.mubr.bf16.gmra.mrb[4].mxu1 %v949_v15 }
  0xfa   : > { %v880_v17 = vpop.f32.mrb[0].mxu0  ;;  %v888_v19 = vpop.f32.mrb[0].mxu1 }
  0xfb   : > { %v622_v20 = vmul.f32 %v880_v17, %v1060_v16  ;;  %v630_v21 = vmul.f32 %v888_v19, %v1060_v16  ;;  %v499_v22 = vpop.f32.mrb[1].mxu0  ;;  %v531_v23 = vpop.f32.mrb[1].mxu1 }
  0xfc   : > { %v620_v24 = vmul.f32 %v1060_v16, %v499_v22  ;;  %v628_v25 = vmul.f32 %v1060_v16, %v531_v23  ;;  %v881_v26 = vpop.f32.mrb[2].mxu0  ;;  %v889_v27 = vpop.f32.mrb[2].mxu1 }
  0xfd   : > { %v645_v28 = vadd.f32 %v1065_v18, %v622_v20  ;;  %v653_v29 = vadd.f32 %v1065_v18, %v630_v21  ;;  %v623_v30 = vmul.f32 %v881_v26, %v1060_v16  ;;  %v631_v31 = vmul.f32 %v889_v27, %v1060_v16  ;;  %v502_v32 = vpop.f32.mrb[3].mxu0  ;;  %v534_v33 = vpop.f32.mrb[3].mxu1 }
  0xfe   : > { %v643_v34 = vadd.f32 %v1065_v18, %v620_v24  ;;  %v651_v35 = vadd.f32 %v1065_v18, %v628_v25  ;;  %v621_v36 = vmul.f32 %v1060_v16, %v502_v32  ;;  %v629_v37 = vmul.f32 %v1060_v16, %v534_v33 }
  0xff   : > { %v661_v38 = vmax.f32 %v645_v28, 0.0  ;;  %v669_v39 = vmax.f32 %v653_v29, 0.0  ;;  %v646_v40 = vadd.f32 %v1065_v18, %v623_v30  ;;  %v654_v41 = vadd.f32 %v1065_v18, %v631_v31 }
 0x100   : > { %v659_v42 = vmax.f32 %v643_v34, 0.0  ;;  %v667_v43 = vmax.f32 %v651_v35, 0.0  ;;  %v644_v44 = vadd.f32 %v1065_v18, %v621_v36  ;;  %v652_v45 = vadd.f32 %v1065_v18, %v629_v37 }
 0x101   : > { %677 = vst [vmem:[%s1079_s24 + $0x10] sm:$0xff] %v661_v38  ;;  %685 = vst [vmem:[%s1079_s24 + $0x50] sm:$0xff] %v669_v39  ;;  %v662_v46 = vmax.f32 %v646_v40, 0.0  ;;  %v670_v47 = vmax.f32 %v654_v41, 0.0 }
 0x102   : > { %675 = vst [vmem:[%s1079_s24] sm:$0xff] %v659_v42  ;;  %683 = vst [vmem:[%s1079_s24 + $0x40] sm:$0xff] %v667_v43  ;;  %v660_v48 = vmax.f32 %v644_v44, 0.0  ;;  %v668_v49 = vmax.f32 %v652_v45, 0.0  ;;  %v884_v50 = vpop.f32.mrb[4].mxu0  ;;  %v892_v51 = vpop.f32.mrb[4].mxu1 }
 0x103   : > { %678 = vst [vmem:[%s1079_s24 + $0x18] sm:$0xff] %v662_v46  ;;  %686 = vst [vmem:[%s1079_s24 + $0x58] sm:$0xff] %v670_v47  ;;  %v626_v52 = vmul.f32 %v884_v50, %v1060_v16  ;;  %v634_v53 = vmul.f32 %v892_v51, %v1060_v16  ;;  %v515_v54 = vpop.f32.mrb[5].mxu0  ;;  %v547_v55 = vpop.f32.mrb[5].mxu1 }
 0x104   : > { %676 = vst [vmem:[%s1079_s24 + $0x8] sm:$0xff] %v660_v48  ;;  %684 = vst [vmem:[%s1079_s24 + $0x48] sm:$0xff] %v668_v49  ;;  %v624_v56 = vmul.f32 %v1060_v16, %v515_v54  ;;  %v632_v57 = vmul.f32 %v1060_v16, %v547_v55  ;;  %v885_v58 = vpop.f32.mrb[6].mxu0  ;;  %v893_v59 = vpop.f32.mrb[6].mxu1 }
 0x105   : > { %v649_v60 = vadd.f32 %v1065_v18, %v626_v52  ;;  %v657_v61 = vadd.f32 %v1065_v18, %v634_v53  ;;  %v627_v62 = vmul.f32 %v885_v58, %v1060_v16  ;;  %v635_v63 = vmul.f32 %v893_v59, %v1060_v16  ;;  %v518_v0 = vpop.f32.mrb[7].mxu0  ;;  %v550_v1 = vpop.f32.mrb[7].mxu1 }
 0x106   : > { %v647_v2 = vadd.f32 %v1065_v18, %v624_v56  ;;  %v655_v3 = vadd.f32 %v1065_v18, %v632_v57  ;;  %v625_v4 = vmul.f32 %v1060_v16, %v518_v0  ;;  %v633_v5 = vmul.f32 %v1060_v16, %v550_v1 }
 0x107   : > { %v665_v6 = vmax.f32 %v649_v60, 0.0  ;;  %v673_v7 = vmax.f32 %v657_v61, 0.0  ;;  %v650_v8 = vadd.f32 %v1065_v18, %v627_v62  ;;  %v658_v9 = vadd.f32 %v1065_v18, %v635_v63 }
 0x108   : > { %v663_v10 = vmax.f32 %v647_v2, 0.0  ;;  %v671_v11 = vmax.f32 %v655_v3, 0.0  ;;  %v648_v12 = vadd.f32 %v1065_v18, %v625_v4  ;;  %v656_v13 = vadd.f32 %v1065_v18, %v633_v5 }
 0x109   : > { %681 = vst [vmem:[%s1079_s24 + $0x30] sm:$0xff] %v665_v6  ;;  %689 = vst [vmem:[%s1079_s24 + $0x70] sm:$0xff] %v673_v7  ;;  %v666_v14 = vmax.f32 %v650_v8, 0.0  ;;  %v674_v15 = vmax.f32 %v658_v9, 0.0 }
 0x10a   : > { %679 = vst [vmem:[%s1079_s24 + $0x20] sm:$0xff] %v663_v10  ;;  %687 = vst [vmem:[%s1079_s24 + $0x60] sm:$0xff] %v671_v11  ;;  %v664_v16 = vmax.f32 %v648_v12, 0.0  ;;  %v672_v17 = vmax.f32 %v656_v13, 0.0 }
 0x10b   : > { %682 = vst [vmem:[%s1079_s24 + $0x38] sm:$0xff] %v666_v14  ;;  %690 = vst [vmem:[%s1079_s24 + $0x78] sm:$0xff] %v674_v15 }
 0x10c   : > { %680 = vst [vmem:[%s1079_s24 + $0x28] sm:$0xff] %v664_v16  ;;  %688 = vst [vmem:[%s1079_s24 + $0x68] sm:$0xff] %v672_v17 }
 0x10d PF: > { %s14_s17 = sadd.s32 1, %s972_s17   ;;  %s1135_s15 = smov %s968_s16 }
 0x10e   : > { %p11_p5 = scmp.ge.s32.totalorder %s14_s17, 6   ;;  %s1136_s16 = smov %s1138_s18 }
 0x110   :  { %13 = sbr.rel (!%p11_p5) target bundleno = 2 (0x2), region = 83 }

</bundles_post_ra>
